<compile_context>
chip_gen: v5e
topology: v5e:2x2
jax: 0.10.0
libtpu: 0.0.40
codegen_flags: <defaults>
</compile_context>

<pallas_src>
import functools
import math

import jax
import jax.numpy as jnp
from jax.experimental import pallas as pl
from jax.experimental.pallas import tpu as pltpu


def _round_up(x, m):
    return ((x + m - 1) // m) * m


def _choose_tile(total, max_tile, granule):
    """Largest tile (multiple of `granule`, <= max_tile) that minimizes the
    padded extent of `total`.  Returns (tile, padded_total)."""
    total_g = _round_up(max(int(total), 1), granule)
    hi = min(_round_up(max_tile, granule), total_g)
    best_tile = hi
    best_padded = _round_up(total_g, hi)
    cand = hi
    while cand >= granule:
        padded = _round_up(total_g, cand)
        if padded < best_padded:
            best_padded, best_tile = padded, cand
        cand -= granule
    return best_tile, _round_up(total_g, best_tile)


def _linear_kernel_fused(x_ref, w_ref, b_ref, o_ref, *, op_dtype):
    # Single K block: direct MXU matmul + fused bias epilogue.  The activation
    # is cast to the operand dtype in-register (no wrapper-side convert pass),
    # accumulation is f32 via preferred_element_type, and there is no
    # accumulator scratch round trip.
    x = x_ref[...].astype(op_dtype)
    acc = jnp.dot(x, w_ref[...], preferred_element_type=jnp.float32)
    o_ref[...] = (acc + b_ref[...]).astype(o_ref.dtype)


def _linear_kernel_ksplit(x_ref, w_ref, b_ref, o_ref, acc_ref, *, op_dtype):
    # Fallback for very large D_s: K is tiled, f32 accumulator with
    # init/finalize gated by pl.when; bias added exactly once after full K.
    k = pl.program_id(2)

    @pl.when(k == 0)
    def _():
        acc_ref[...] = jnp.zeros_like(acc_ref)

    acc_ref[...] += jnp.dot(
        x_ref[...].astype(op_dtype), w_ref[...],
        preferred_element_type=jnp.float32,
    )

    @pl.when(k == pl.num_programs(2) - 1)
    def _():
        o_ref[...] = (acc_ref[...] + b_ref[...]).astype(o_ref.dtype)


def init_linear_projector(weight, bias, *, compute_dtype=jnp.bfloat16,
                          tn=512, tk=4096):
    """Module-init step: transpose, pad and cast the projector weight ONCE.

    weight: torch nn.Linear layout (D_t, D_s);  bias: (D_t,)
    Returns a params dict consumed by linear_projector_forward.
    """
    d_t, d_s = weight.shape

    # N tiling: output lane-dense (multiple of 128) -> unmasked full-width vst.
    tn, n_p = _choose_tile(d_t, tn, 128)

    # K axis: prefer a single block (tk == D_s) so the kernel needs no
    # accumulator scratch and the weight column stays VMEM-resident across all
    # M tiles.  Only split K for very large D_s (VMEM budget cap).
    if d_s <= tk:
        tk_sel, k_p = d_s, d_s
    else:
        tk_sel, k_p = _choose_tile(d_s, tk, 128)

    w_t = jnp.asarray(weight).T                    # (D_s, D_t), transposed once
    if (k_p, n_p) != (d_s, d_t):
        w_t = jnp.pad(w_t, ((0, k_p - d_s), (0, n_p - d_t)))
    w_t = w_t.astype(compute_dtype)                # pad + cast done at init only

    b = jnp.asarray(bias, jnp.float32).reshape(1, d_t)
    if n_p != d_t:
        b = jnp.pad(b, ((0, 0), (0, n_p - d_t)))

    return dict(w=w_t, b=b, d_s=d_s, d_t=d_t, tn=tn, tk=tk_sel,
                n_p=n_p, k_p=k_p, compute_dtype=compute_dtype)


def linear_projector_forward(params, student_features, teacher_features, *,
                             tm=512, out_dtype=None):
    """Pallas equivalent of LinearProjector.forward.

    student_features: (..., D_s);  teacher_features passed through unchanged.
    Returns (projected_student, teacher_features).
    """
    d_s, d_t = params["d_s"], params["d_t"]
    tn, tk = params["tn"], params["tk"]
    n_p, k_p = params["n_p"], params["k_p"]
    op_dtype = params["compute_dtype"]
    w, b = params["w"], params["b"]

    *lead, d_s_in = student_features.shape
    assert d_s_in == d_s, (d_s_in, d_s)
    m = int(math.prod(lead)) if lead else 1
    out_dtype = student_features.dtype if out_dtype is None else out_dtype

    # M tiling: 8-sublane granule, minimize padded rows for awkward M.
    tm, m_p = _choose_tile(m, tm, 8)
    n_blocks = n_p // tn
    m_blocks = m_p // tm
    k_blocks = k_p // tk

    # v7x has 2 TensorCores sharding the "parallel" grid axes; a 1x1 parallel
    # grid idles one core, so split M when the tile is big enough to matter.
    if n_blocks * m_blocks == 1 and tm >= 256:
        m_blocks = 2
        tm = _round_up(-(-m // 2), 8)
        m_p = tm * 2

    x2d = student_features.reshape(m, d_s)
    if (m_p, k_p) != (m, d_s):
        x2d = jnp.pad(x2d, ((0, m_p - m), (0, k_p - d_s)))
    # NOTE: x is intentionally NOT cast here; the cast to `op_dtype` happens
    # inside the kernel to avoid a separate HBM read+write of the activation.

    x_bytes = x2d.size * x2d.dtype.itemsize
    w_bytes = w.size * w.dtype.itemsize
    o_bytes = m_p * n_p * jnp.dtype(out_dtype).itemsize
    b_bytes = b.size * b.dtype.itemsize

    if k_blocks == 1:
        grid = (n_blocks, m_blocks)                       # M innermost
        kernel = functools.partial(_linear_kernel_fused, op_dtype=op_dtype)
        in_specs = [
            pl.BlockSpec((tm, k_p), lambda j, i: (i, 0)),  # x
            pl.BlockSpec((k_p, tn), lambda j, i: (0, j)),  # w: resident per j
            pl.BlockSpec((1, tn), lambda j, i: (0, j)),    # bias
        ]
        out_specs = pl.BlockSpec((tm, tn), lambda j, i: (i, j))
        scratch_shapes = []
        dims = ("parallel", "parallel")
        bytes_accessed = (x_bytes * n_blocks + w_bytes + o_bytes
                          + b_bytes * n_blocks)
    else:
        grid = (n_blocks, m_blocks, k_blocks)             # K innermost
        kernel = functools.partial(_linear_kernel_ksplit, op_dtype=op_dtype)
        in_specs = [
            pl.BlockSpec((tm, tk), lambda j, i, k: (i, k)),
            pl.BlockSpec((tk, tn), lambda j, i, k: (k, j)),
            pl.BlockSpec((1, tn), lambda j, i, k: (0, j)),
        ]
        out_specs = pl.BlockSpec((tm, tn), lambda j, i, k: (i, j))
        scratch_shapes = [pltpu.VMEM((tm, tn), jnp.float32)]
        dims = ("parallel", "parallel", "arbitrary")
        bytes_accessed = (x_bytes * n_blocks + w_bytes * m_blocks + o_bytes
                          + b_bytes * n_blocks * m_blocks)

    cost = pl.CostEstimate(flops=2 * m * d_s * d_t, transcendentals=0,
                           bytes_accessed=int(bytes_accessed))

    out2d = pl.pallas_call(
        kernel,
        out_shape=jax.ShapeDtypeStruct((m_p, n_p), out_dtype),
        grid_spec=pltpu.PrefetchScalarGridSpec(
            num_scalar_prefetch=0,
            grid=grid,
            in_specs=in_specs,
            out_specs=out_specs,
            scratch_shapes=scratch_shapes,
        ),
        compiler_params=pltpu.CompilerParams(
            dimension_semantics=dims,
            # Above the 16/32 MiB scoped defaults (v5e/v6e/v7x) so the larger
            # tiles are accepted; below v7x's 64 MiB physical per-TC VMEM.
            vmem_limit_bytes=48 << 20,
        ),
        cost_estimate=cost,
    )(x2d, w, b)

    out2d = out2d[:m, :d_t]
    return out2d.reshape(*lead, d_t), teacher_features


if __name__ == "__main__":
    # Shapes implied by the module: student (B, S, D_s), teacher (B, S, D_t).
    B, S, D_S, D_T = 2, 8, 32, 64

    key = jax.random.PRNGKey(0)
    k_student, k_teacher, k_w, k_b = jax.random.split(key, 4)

    student = jax.random.normal(k_student, (B, S, D_S), dtype=jnp.float32)
    teacher = jax.random.normal(k_teacher, (B, S, D_T), dtype=jnp.float32)

    # Deterministic nn.Linear-style init: U(-1/sqrt(D_S), 1/sqrt(D_S)),
    # torch weight layout (D_T, D_S).
    bound = 1.0 / math.sqrt(D_S)
    weight = jax.random.uniform(k_w, (D_T, D_S), minval=-bound, maxval=bound,
                                dtype=jnp.float32)
    bias = jax.random.uniform(k_b, (D_T,), minval=-bound, maxval=bound,
                              dtype=jnp.float32)

    ref = student @ weight.T + bias

    # --- f32 compute path: exact parity with the reference ---
    params_f32 = init_linear_projector(weight, bias, compute_dtype=jnp.float32)
    proj_f32, teacher_out = linear_projector_forward(params_f32, student, teacher)
    jax.block_until_ready(proj_f32)
    jax.block_until_ready(teacher_out)
    assert proj_f32.shape == (B, S, D_T)
    assert teacher_out.shape == teacher.shape
    assert jnp.allclose(proj_f32, ref, atol=1e-5, rtol=1e-5)
    assert jnp.array_equal(teacher_out, teacher)

    # --- bf16 operand path (default; MXU-optimal) with f32 accumulation ---
    params_bf16 = init_linear_projector(weight, bias)
    proj_bf16, _ = linear_projector_forward(params_bf16, student, teacher)
    jax.block_until_ready(proj_bf16)
    assert proj_bf16.shape == (B, S, D_T)
    assert jnp.allclose(proj_bf16, ref, atol=5e-2, rtol=5e-2)

    print("KERNEL_OK")
</pallas_src>

<mosaic_0001>
module attributes {stable_mosaic.version = 11 : i64} {
  func.func @_linear_kernel_fused(%arg0: i32, %arg1: i32, %arg2: memref<16x32xf32, #tpu.memory_space<vmem>>, %arg3: memref<32x128xf32, #tpu.memory_space<vmem>>, %arg4: memref<1x128xf32, #tpu.memory_space<vmem>>, %arg5: memref<16x128xf32, #tpu.memory_space<vmem>>) attributes {dimension_semantics = [#tpu.dimension_semantics<parallel>, #tpu.dimension_semantics<parallel>], iteration_bounds = array<i64: 1, 1>, scalar_prefetch = 0 : i64, scratch_operands = 0 : i64, tpu.core_type = #tpu.core_type<tc>, window_params = [{transform_indices = @transform_0, window_bounds = array<i64: 16, 32>}, {transform_indices = @transform_1, window_bounds = array<i64: 32, 128>}, {transform_indices = @transform_2, window_bounds = array<i64: 1, 128>}, {transform_indices = @transform_3, window_bounds = array<i64: 16, 128>}]} {
    %c0 = arith.constant 0 : index
    %c0_0 = arith.constant 0 : index
    %0 = vector.load %arg2[%c0, %c0_0] : memref<16x32xf32, #tpu.memory_space<vmem>>, vector<16x32xf32>
    %c0_1 = arith.constant 0 : index
    %c0_2 = arith.constant 0 : index
    %1 = vector.load %arg3[%c0_1, %c0_2] : memref<32x128xf32, #tpu.memory_space<vmem>>, vector<32x128xf32>
    %cst = arith.constant dense<0.000000e+00> : vector<16x128xf32>
    %2 = tpu.matmul %0, %1, %cst {dimension_numbers = #tpu.dot_dimension_numbers<[1], [0], [0], [1], [0, 0, 1, 1], [], []>} : vector<16x32xf32>, vector<32x128xf32>, vector<16x128xf32> -> vector<16x128xf32>
    %c0_3 = arith.constant 0 : index
    %c0_4 = arith.constant 0 : index
    %3 = vector.load %arg4[%c0_3, %c0_4] : memref<1x128xf32, #tpu.memory_space<vmem>>, vector<1x128xf32>
    %4 = vector.broadcast %3 : vector<1x128xf32> to vector<16x128xf32>
    %5 = arith.addf %2, %4 : vector<16x128xf32>
    %c0_5 = arith.constant 0 : index
    %c0_6 = arith.constant 0 : index
    %6 = vector.load %arg5[%c0_5, %c0_6] : memref<16x128xf32, #tpu.memory_space<vmem>>, vector<16x128xf32>
    tpu.vector_store %arg5[%c0_5, %c0_6], %5 {strides = array<i32>} : memref<16x128xf32, #tpu.memory_space<vmem>>, vector<16x128xf32>,
    return
  }
  func.func @transform_0(%arg0: i32, %arg1: i32) -> (i32, i32) {
    %c0_i32 = arith.constant 0 : i32
    %c0_i32_0 = arith.constant 0 : i32
    return %arg1, %c0_i32 : i32, i32
  }
  func.func @transform_1(%arg0: i32, %arg1: i32) -> (i32, i32) {
    %c0_i32 = arith.constant 0 : i32
    %c0_i32_0 = arith.constant 0 : i32
    return %c0_i32, %arg0 : i32, i32
  }
  func.func @transform_2(%arg0: i32, %arg1: i32) -> (i32, i32) {
    %c0_i32 = arith.constant 0 : i32
    %c0_i32_0 = arith.constant 0 : i32
    return %c0_i32, %arg0 : i32, i32
  }
  func.func @transform_3(%arg0: i32, %arg1: i32) -> (i32, i32) {
    %c0_i32 = arith.constant 0 : i32
    return %arg1, %arg0 : i32, i32
  }
}

</mosaic_0001>

<bundles_post_ra>
// kernel: tpu_custom_call.1
= control target key start
LH: loop header
LB: loop body
LE: loop exit
PB: predicated region body
PF: predicated region fallthrough
CT: control target
= control target key end

     0   :  { %8 = vsyncpa [#allocation3], 0  ;;  %s245_s0 = inlined_call_operand.hbm [shape: f32[16,32], index: 0, kind: input, shape index: {}]   ;;  %s246_s1 = inlined_call_operand.hbm [shape: f32[32,128], index: 1, kind: input, shape index: {}]   ;;  %s247_s2 = inlined_call_operand.vmem [shape: f32[1,128], index: 2, kind: input, shape index: {}]   ;;  %s248_s3 = inlined_call_operand.hbm [shape: f32[16,128], index: 3, kind: output, shape index: {}]  }
   0x1   :  { %9 = vsyncpa [#allocation6], 0 }
   0x2   :  { %10 = vsyncpa [#allocation4], 0  ;;  %s15_s14 = sshll.u32 %s245_s0, 4  ;;  %s199_s15 = smov [#allocation2]   ;;  %s16_s14 = int_to_ptr.hbm [resolvable:$true] %s15_s14 }
   0x3   :  { %s17_s16 = sshll.u32 %s199_s15, 4  ;;  %s28_s19 = sshll.u32 %s246_s1, 4  ;;  %s18_s16 = int_to_ptr.vmem [resolvable:$true] %s17_s16  ;;  %s29_s19 = int_to_ptr.hbm [resolvable:$true] %s28_s19 }
   0x4   :  { %s200_s20 = smov 128   ;;  %s201_s21 = smov 8  }
   0x5   :  { %23 = dma.hbm_to_vmem [thread:$0]  %s16_s14, 256, %s18_s16, [#allocation3], %s200_s20, %s200_s20, %s201_s21  }
   0x6   :  { %s202_s22 = smov [#allocation5]  }
   0x7   :  { %s30_s23 = sshll.u32 %s202_s22, 4  ;;  %s31_s23 = int_to_ptr.vmem [resolvable:$true] %s30_s23 }
   0x8   :  { %36 = dma.hbm_to_vmem [thread:$0]  %s29_s19, 512, %s31_s23, [#allocation6], %s200_s20, %s200_s20, %s201_s21  }
   0x9   :  { %193 = dma.done.wait [#allocation3], 256  }
   0xa   :  { %194 = vsyncadd [#allocation3], 4294967040 }
   0xb   :  { %195 = dma.done.wait [#allocation6], 512  }
   0xc   :  { %196 = vsyncadd [#allocation6], 4294966784  ;;  %v52_v0 = vld [vmem:[#allocation5 + $0x18] sm:$0xff]  ;;  %v51_v1 = vld [vmem:[#allocation5 + $0x10] sm:$0xff]  ;;  %vm57_vm0 = vcmask 261120   ;;  %s203_s24 = smov [#allocation7]  }
   0xd   :  { %76 = vmatpush.msra.mxu0 %v52_v0  ;;  %111 = vmatpush.msra.mxu1 %v52_v0  ;;  %v50_v2 = vld [vmem:[#allocation5 + $0x8] sm:$0xff]  ;;  %v49_v3 = vld [vmem:[#allocation5] sm:$0xff]  ;;  %v47_v4 = vld [vmem:[#allocation2] sm:$0xff]  ;;  %s93_s25 = sshll.u32 %s203_s24, 4  ;;  %s95_s28 = sshll.u32 %s248_s3, 4  ;;  %s94_s25 = int_to_ptr.vmem [resolvable:$true] %s93_s25  ;;  %s96_s28 = int_to_ptr.hbm [resolvable:$true] %s95_s28 }
   0xe   :  { %v48_v5 = vld [vmem:[#allocation2 + $0x8] sm:$0xff]  ;;  %v120_v6 = vld [vmem:[%s247_s2] ss:$0 sm:$0xff] }
   0xf   :  { %77 = vmatpush.msra.mxu0 %v51_v1  ;;  %112 = vmatpush.msra.mxu1 %v51_v1 }
  0x11   :  { %78 = vmatpush.msra.mxu0 %v50_v2  ;;  %113 = vmatpush.msra.mxu1 %v50_v2 }
  0x13   :  { %79 = vmatpush.msra.mxu0 %v49_v3  ;;  %114 = vmatpush.msra.mxu1 %v49_v3 }
  0x14   :  { %109 = vmatmul.msk.f32.vlgmr.msra.gmra.mxu0 %vm57_vm0, %v47_v4  ;;  %110 = vmatmul.msk.f32.vlgmr.msra.gmra.mxu1 %vm57_vm0, %v48_v5 }
  0x91   :  { %v81_v7 = vpop.f32.mrf.mxu0  ;;  %v84_v8 = vpop.f32.mrf.mxu1 }
  0x92   :  { %v82_v9 = vadd.f32 %v120_v6, %v81_v7  ;;  %v85_v10 = vadd.f32 %v120_v6, %v84_v8 }
  0x94   :  { %87 = vst [vmem:[#allocation7] sm:$0xff] %v82_v9 }
  0x95   :  { %88 = vst [vmem:[#allocation7 + $0x8] sm:$0xff] %v85_v10 }
  0x96   :  { %101 = dma.vmem_to_hbm [thread:$0]  %s94_s25, 256, %s96_s28, [#allocation4], %s200_s20, %s200_s20, %s201_s21  }
  0x97   :  { %197 = dma.done.wait [#allocation4], 256  }
  0x98   :  { %198 = vsyncadd [#allocation4], 4294967040 }
  0x99   :  { %106 = vsyncpa [#allocation3], 1 }
  0x9a   :  { %107 = vsyncpa [#allocation6], 1 }
  0x9b   :  { %108 = vsyncpa [#allocation4], 1 }

</bundles_post_ra>
